<compile_context>
chip_gen: v6e
topology: v6e:2x2x1
jax: 0.10.0
libtpu: 0.0.40
codegen_flags: <defaults>
</compile_context>

<pallas_src>
import jax
import jax.numpy as jnp
from jax.experimental import pallas as pl
from jax.experimental.pallas import tpu as pltpu


def _round_up(x, m):
    return (x + m - 1) // m * m


def mlp4_kernel(data_ref, wexp_ref, bf_ref, w1_ref, b1_ref, w2_ref, b2_ref,
                out_ref):
    # The packed-weight dtype (bf16 or f32) decides MXU input precision;
    # accumulation is always f32 via preferred_element_type.
    mxu_dt = wexp_ref.dtype

    data = data_ref[...].astype(mxu_dt)                        # [TB, 4]

    # Layer 0: all four Linear(1,64)+ReLU branches as one K=4 matmul against
    # the block-diagonal expansion matrix (exactly equivalent to the concat).
    x_all = jnp.dot(data, wexp_ref[...],
                    preferred_element_type=jnp.float32) + bf_ref[...]
    x_all = jnp.maximum(x_all, 0.0)                            # [TB, 256] f32

    # fc1 + ReLU: single K=256 MXU pass.
    x = jnp.dot(x_all.astype(mxu_dt), w1_ref[...],
                preferred_element_type=jnp.float32) + b1_ref[...]
    x = jnp.maximum(x, 0.0)                                    # [TB, 64] f32

    # fc2 (output lane-padded to a multiple of 128 by the wrapper).
    out = jnp.dot(x.astype(mxu_dt), w2_ref[...],
                  preferred_element_type=jnp.float32) + b2_ref[...]
    out_ref[...] = out.astype(out_ref.dtype)                   # [TB, OUT_PAD]


def mlp4_forward(data, w_feat, b_feat, w1, b1, w2, b2, *,
                 block_b=512, use_bf16=True):
    """data: [B, 4] f32.  Weight layout documented in init_params."""
    B = data.shape[0]
    out_dim = w2.shape[1]
    mxu_dt = jnp.bfloat16 if use_bf16 else jnp.float32

    # (a) Block-diagonal expansion of the four Linear(1, 64) layers.
    w_exp = jnp.zeros((4, 256), jnp.float32)
    for k in range(4):
        w_exp = w_exp.at[k, 64 * k:64 * (k + 1)].set(w_feat[k])
    bf_flat = b_feat.reshape(1, 256).astype(jnp.float32)

    # (b) Lane-dense output: zero-pad output_dim up to a multiple of 128.
    out_pad = _round_up(out_dim, 128)
    w2p = jnp.zeros((64, out_pad), jnp.float32).at[:, :out_dim].set(w2)
    b2p = jnp.zeros((1, out_pad), jnp.float32).at[:, :out_dim].set(b2)

    # MXU operands in bf16 (f32 accumulation inside the kernel); biases f32.
    w_exp = w_exp.astype(mxu_dt)
    w1c = w1.astype(mxu_dt)
    w2p = w2p.astype(mxu_dt)

    # (c) Batch tiling: tile multiple of 8 sublanes; pad B to the tile.
    tb = min(block_b, _round_up(B, 8))
    b_pad = _round_up(B, tb)
    if b_pad != B:
        data = jnp.pad(data, ((0, b_pad - B), (0, 0)))
    grid = (b_pad // tb,)

    def resident(shape):
        return pl.BlockSpec(shape, lambda i: (0,) * len(shape))

    flops = 2 * b_pad * (4 * 256 + 256 * 64 + 64 * out_pad)
    bytes_accessed = (
        4 * b_pad * 4 + 4 * b_pad * out_pad
        + w_exp.size * w_exp.dtype.itemsize
        + w1c.size * w1c.dtype.itemsize
        + w2p.size * w2p.dtype.itemsize
        + (bf_flat.size + b1.size + b2p.size) * 4)

    out = pl.pallas_call(
        mlp4_kernel,
        out_shape=jax.ShapeDtypeStruct((b_pad, out_pad), jnp.float32),
        grid=grid,
        in_specs=[
            pl.BlockSpec((tb, 4), lambda i: (i, 0)),   # data: tiled over batch
            resident((4, 256)),                        # Wexp (block-diagonal)
            resident((1, 256)),                        # flattened branch biases
            resident((256, 64)),                       # W1
            resident((1, 64)),                         # b1
            resident((64, out_pad)),                   # W2 (lane-padded)
            resident((1, out_pad)),                    # b2 (lane-padded)
        ],
        out_specs=pl.BlockSpec((tb, out_pad), lambda i: (i, 0)),
        compiler_params=pltpu.CompilerParams(
            dimension_semantics=("parallel",),
            vmem_limit_bytes=64 * 1024 * 1024),
        cost_estimate=pl.CostEstimate(
            flops=flops, transcendentals=0, bytes_accessed=bytes_accessed),
    )(data, w_exp, bf_flat, w1c, b1, w2p, b2p)

    return out[:B, :out_dim]


def init_params(key, output_dim):
    # Mirrors PyTorch nn.Linear default init: U(-1/sqrt(fan_in), 1/sqrt(fan_in)).
    keys = jax.random.split(key, 12)

    def uniform(k, shape, fan_in):
        bound = 1.0 / jnp.sqrt(float(fan_in))
        return jax.random.uniform(k, shape, jnp.float32, -bound, bound)

    # Four Linear(1, 64) layers, packed: weight [4, 64], bias [4, 64].
    w_feat = jnp.stack([uniform(keys[i], (64,), 1) for i in range(4)], axis=0)
    b_feat = jnp.stack([uniform(keys[4 + i], (64,), 1) for i in range(4)], axis=0)
    # fc1: Linear(256, 64) -> stored transposed [256, 64].
    w1 = uniform(keys[8], (256, 64), 256)
    b1 = uniform(keys[9], (1, 64), 256)
    # fc2: Linear(64, output_dim) -> stored transposed [64, output_dim].
    w2 = uniform(keys[10], (64, output_dim), 64)
    b2 = uniform(keys[11], (1, output_dim), 64)
    return w_feat, b_feat, w1, b1, w2, b2


def reference_forward(data, w_feat, b_feat, w1, b1, w2, b2):
    # Plain-JAX reference of the PyTorch forward for correctness checking.
    hs = []
    for k in range(4):
        col = data[:, k:k + 1]                      # [B, 1]
        hs.append(jnp.maximum(col * w_feat[k] + b_feat[k], 0.0))
    x_all = jnp.concatenate(hs, axis=1)             # [B, 256]
    x = jnp.maximum(x_all @ w1 + b1, 0.0)
    return x @ w2 + b2


if __name__ == "__main__":
    key = jax.random.PRNGKey(0)
    k_data, k_params = jax.random.split(key)

    input_dim = 4   # forward uses the first 4 columns (E, F, H, I)
    output_dim = 8
    params = init_params(k_params, output_dim)

    # 1) Small batch, f32 MXU path -> exact (tight tolerance) check.
    B = 8
    data = jax.random.normal(k_data, (B, input_dim), jnp.float32)
    out_f32 = jax.block_until_ready(mlp4_forward(data, *params, use_bf16=False))
    ref = reference_forward(data, *params)
    assert out_f32.shape == (B, output_dim)
    assert jnp.allclose(out_f32, ref, atol=1e-5, rtol=1e-5)

    # 2) Non-tile-aligned batch with a multi-step grid, bf16 MXU operands
    #    (f32 accumulation) -> loose tolerance for the bf16 cast.
    B2 = 200
    data2 = jax.random.normal(jax.random.PRNGKey(1), (B2, input_dim), jnp.float32)
    out_bf16 = jax.block_until_ready(
        mlp4_forward(data2, *params, block_b=64, use_bf16=True))
    ref2 = reference_forward(data2, *params)
    assert out_bf16.shape == (B2, output_dim)
    assert jnp.allclose(out_bf16, ref2, atol=1e-1, rtol=1e-1)

    print("KERNEL_OK")
</pallas_src>

<mosaic_0001>
module attributes {stable_mosaic.version = 11 : i64} {
  func.func @mlp4_kernel(%arg0: i32, %arg1: memref<8x4xf32, #tpu.memory_space<vmem>>, %arg2: memref<4x256xf32, #tpu.memory_space<vmem>>, %arg3: memref<1x256xf32, #tpu.memory_space<vmem>>, %arg4: memref<256x64xf32, #tpu.memory_space<vmem>>, %arg5: memref<1x64xf32, #tpu.memory_space<vmem>>, %arg6: memref<64x128xf32, #tpu.memory_space<vmem>>, %arg7: memref<1x128xf32, #tpu.memory_space<vmem>>, %arg8: memref<8x128xf32, #tpu.memory_space<vmem>>) attributes {dimension_semantics = [#tpu.dimension_semantics<parallel>], iteration_bounds = array<i64: 1>, scalar_prefetch = 0 : i64, scratch_operands = 0 : i64, tpu.core_type = #tpu.core_type<tc>, window_params = [{transform_indices = @transform_0, window_bounds = array<i64: 8, 4>}, {pipeline_mode = #tpu.pipeline_mode<synchronous>, transform_indices = @transform_1, window_bounds = array<i64: 4, 256>}, {pipeline_mode = #tpu.pipeline_mode<synchronous>, transform_indices = @transform_2, window_bounds = array<i64: 1, 256>}, {pipeline_mode = #tpu.pipeline_mode<synchronous>, transform_indices = @transform_3, window_bounds = array<i64: 256, 64>}, {pipeline_mode = #tpu.pipeline_mode<synchronous>, transform_indices = @transform_4, window_bounds = array<i64: 1, 64>}, {pipeline_mode = #tpu.pipeline_mode<synchronous>, transform_indices = @transform_5, window_bounds = array<i64: 64, 128>}, {pipeline_mode = #tpu.pipeline_mode<synchronous>, transform_indices = @transform_6, window_bounds = array<i64: 1, 128>}, {transform_indices = @transform_7, window_bounds = array<i64: 8, 128>}]} {
    %c0 = arith.constant 0 : index
    %c0_0 = arith.constant 0 : index
    %0 = vector.load %arg1[%c0, %c0_0] : memref<8x4xf32, #tpu.memory_space<vmem>>, vector<8x4xf32>
    %c0_1 = arith.constant 0 : index
    %c0_2 = arith.constant 0 : index
    %1 = vector.load %arg2[%c0_1, %c0_2] : memref<4x256xf32, #tpu.memory_space<vmem>>, vector<4x256xf32>
    %cst = arith.constant dense<0.000000e+00> : vector<8x256xf32>
    %2 = tpu.matmul %0, %1, %cst {dimension_numbers = #tpu.dot_dimension_numbers<[1], [0], [0], [1], [0, 0, 1, 1], [], []>} : vector<8x4xf32>, vector<4x256xf32>, vector<8x256xf32> -> vector<8x256xf32>
    %c0_3 = arith.constant 0 : index
    %c0_4 = arith.constant 0 : index
    %3 = vector.load %arg3[%c0_3, %c0_4] : memref<1x256xf32, #tpu.memory_space<vmem>>, vector<1x256xf32>
    %4 = vector.broadcast %3 : vector<1x256xf32> to vector<8x256xf32>
    %5 = arith.addf %2, %4 : vector<8x256xf32>
    %cst_5 = arith.constant 0.000000e+00 : f32
    %6 = vector.broadcast %cst_5 : f32 to vector<8x256xf32>
    %7 = arith.maximumf %5, %6 : vector<8x256xf32>
    %c0_6 = arith.constant 0 : index
    %c0_7 = arith.constant 0 : index
    %8 = vector.load %arg4[%c0_6, %c0_7] : memref<256x64xf32, #tpu.memory_space<vmem>>, vector<256x64xf32>
    %cst_8 = arith.constant dense<0.000000e+00> : vector<8x64xf32>
    %9 = tpu.matmul %7, %8, %cst_8 {dimension_numbers = #tpu.dot_dimension_numbers<[1], [0], [0], [1], [0, 0, 1, 1], [], []>} : vector<8x256xf32>, vector<256x64xf32>, vector<8x64xf32> -> vector<8x64xf32>
    %c0_9 = arith.constant 0 : index
    %c0_10 = arith.constant 0 : index
    %10 = vector.load %arg5[%c0_9, %c0_10] : memref<1x64xf32, #tpu.memory_space<vmem>>, vector<1x64xf32>
    %11 = vector.broadcast %10 : vector<1x64xf32> to vector<8x64xf32>
    %12 = arith.addf %9, %11 : vector<8x64xf32>
    %cst_11 = arith.constant 0.000000e+00 : f32
    %13 = vector.broadcast %cst_11 : f32 to vector<8x64xf32>
    %14 = arith.maximumf %12, %13 : vector<8x64xf32>
    %c0_12 = arith.constant 0 : index
    %c0_13 = arith.constant 0 : index
    %15 = vector.load %arg6[%c0_12, %c0_13] : memref<64x128xf32, #tpu.memory_space<vmem>>, vector<64x128xf32>
    %cst_14 = arith.constant dense<0.000000e+00> : vector<8x128xf32>
    %16 = tpu.matmul %14, %15, %cst_14 {dimension_numbers = #tpu.dot_dimension_numbers<[1], [0], [0], [1], [0, 0, 1, 1], [], []>} : vector<8x64xf32>, vector<64x128xf32>, vector<8x128xf32> -> vector<8x128xf32>
    %c0_15 = arith.constant 0 : index
    %c0_16 = arith.constant 0 : index
    %17 = vector.load %arg7[%c0_15, %c0_16] : memref<1x128xf32, #tpu.memory_space<vmem>>, vector<1x128xf32>
    %18 = vector.broadcast %17 : vector<1x128xf32> to vector<8x128xf32>
    %19 = arith.addf %16, %18 : vector<8x128xf32>
    %c0_17 = arith.constant 0 : index
    %c0_18 = arith.constant 0 : index
    %20 = vector.load %arg8[%c0_17, %c0_18] : memref<8x128xf32, #tpu.memory_space<vmem>>, vector<8x128xf32>
    tpu.vector_store %arg8[%c0_17, %c0_18], %19 {strides = array<i32>} : memref<8x128xf32, #tpu.memory_space<vmem>>, vector<8x128xf32>,
    return
  }
  func.func @transform_0(%arg0: i32) -> (i32, i32) {
    %c0_i32 = arith.constant 0 : i32
    %c0_i32_0 = arith.constant 0 : i32
    return %arg0, %c0_i32 : i32, i32
  }
  func.func @transform_1(%arg0: i32) -> (i32, i32) {
    %c0_i32 = arith.constant 0 : i32
    %c0_i32_0 = arith.constant 0 : i32
    %c0_i32_1 = arith.constant 0 : i32
    return %c0_i32, %c0_i32_0 : i32, i32
  }
  func.func @transform_2(%arg0: i32) -> (i32, i32) {
    %c0_i32 = arith.constant 0 : i32
    %c0_i32_0 = arith.constant 0 : i32
    %c0_i32_1 = arith.constant 0 : i32
    return %c0_i32, %c0_i32_0 : i32, i32
  }
  func.func @transform_3(%arg0: i32) -> (i32, i32) {
    %c0_i32 = arith.constant 0 : i32
    %c0_i32_0 = arith.constant 0 : i32
    %c0_i32_1 = arith.constant 0 : i32
    return %c0_i32, %c0_i32_0 : i32, i32
  }
  func.func @transform_4(%arg0: i32) -> (i32, i32) {
    %c0_i32 = arith.constant 0 : i32
    %c0_i32_0 = arith.constant 0 : i32
    %c0_i32_1 = arith.constant 0 : i32
    return %c0_i32, %c0_i32_0 : i32, i32
  }
  func.func @transform_5(%arg0: i32) -> (i32, i32) {
    %c0_i32 = arith.constant 0 : i32
    %c0_i32_0 = arith.constant 0 : i32
    %c0_i32_1 = arith.constant 0 : i32
    return %c0_i32, %c0_i32_0 : i32, i32
  }
  func.func @transform_6(%arg0: i32) -> (i32, i32) {
    %c0_i32 = arith.constant 0 : i32
    %c0_i32_0 = arith.constant 0 : i32
    %c0_i32_1 = arith.constant 0 : i32
    return %c0_i32, %c0_i32_0 : i32, i32
  }
  func.func @transform_7(%arg0: i32) -> (i32, i32) {
    %c0_i32 = arith.constant 0 : i32
    %c0_i32_0 = arith.constant 0 : i32
    return %arg0, %c0_i32 : i32, i32
  }
}

</mosaic_0001>

<bundles_post_ra>
// kernel: tpu_custom_call.1
= control target key start
LH: loop header
LB: loop body
LE: loop exit
PB: predicated region body
PF: predicated region fallthrough
CT: control target
= control target key end

     0   :  { %vm47_vm0 = vcmask 1043456   ;;  %v434_v3 = vmov 0.0   ;;  %vm43_vm1 = vcmask 31744   ;;  %s627_s0 = inlined_call_operand.vmem [shape: f32[8,4], index: 0, kind: input, shape index: {}]   ;;  %s628_s1 = inlined_call_operand.vmem [shape: f32[4,256], index: 1, kind: input, shape index: {}]   ;;  %s629_s2 = inlined_call_operand.vmem [shape: f32[1,256], index: 2, kind: input, shape index: {}]   ;;  %s630_s3 = inlined_call_operand.vmem [shape: f32[256,64], index: 3, kind: input, shape index: {}]   ;;  %s631_s4 = inlined_call_operand.vmem [shape: f32[1,64], index: 4, kind: input, shape index: {}]   ;;  %s632_s5 = inlined_call_operand.vmem [shape: f32[64,128], index: 5, kind: input, shape index: {}]   ;;  %s633_s6 = inlined_call_operand.vmem [shape: f32[1,128], index: 6, kind: input, shape index: {}]   ;;  %s634_s7 = inlined_call_operand.hbm [shape: f32[8,128], index: 7, kind: output, shape index: {}]  }
   0x1   :  { %v28_v0 = vld [vmem:[%s628_s1] sm:$0xff]  ;;  %v156_v1 = vld [vmem:[%s630_s3 + $0xf8] sm:$0xff]  ;;  %116 = vmatprep.mubr.f32.mxu0 %v434_v3  ;;  %v155_v5 = vld [vmem:[%s630_s3 + $0xf0] sm:$0xff] }
   0x2   :  { %v42_v2 = vcombine.high %v28_v0, %v28_v0  ;;  %345 = vmatprep.subr.mxu1 %v156_v1  ;;  %v140_v4 = vld [vmem:[%s630_s3 + $0x78] sm:$0xff]  ;;  %v139_v6 = vld [vmem:[%s630_s3 + $0x70] sm:$0xff]  ;;  %v27_v7 = vld [vmem:[%s627_s0] sm:$0xff] }
   0x3   :  { %346 = vmatpush3.msra.mxu1 %v140_v4  ;;  %v154_v8 = vld [vmem:[%s630_s3 + $0xe8] sm:$0xff]  ;;  %v153_v10 = vld [vmem:[%s630_s3 + $0xe0] sm:$0xff]  ;;  %v152_v12 = vld [vmem:[%s630_s3 + $0xd8] sm:$0xff] }
   0x4   :  { %339 = vmatprep.subr.msk.mxu0 %vm47_vm0, %v42_v2  ;;  %347 = vmatprep.subr.mxu1 %v155_v5  ;;  %v138_v9 = vld [vmem:[%s630_s3 + $0x68] sm:$0xff]  ;;  %v137_v11 = vld [vmem:[%s630_s3 + $0x60] sm:$0xff]  ;;  %v136_v13 = vld [vmem:[%s630_s3 + $0x58] sm:$0xff] }
   0x5   :  { %340 = vmatpush1.msk.msra.mxu0 %vm47_vm0, %v28_v0  ;;  %348 = vmatpush3.msra.mxu1 %v139_v6  ;;  %v151_v14 = vld [vmem:[%s630_s3 + $0xd0] sm:$0xff] }
   0x6   :  { %341 = vmatmul.mubr.msk.f32.vlgmr.msra.gmra.mxu0 %vm43_vm1, %v27_v7  ;;  %349 = vmatprep.subr.mxu1 %v154_v8  ;;  %v135_v15 = vld [vmem:[%s630_s3 + $0x50] sm:$0xff] }
   0x7   :  { %350 = vmatpush3.msra.mxu1 %v138_v9  ;;  %389 = vmatprep.subr.mxu0 %v434_v3 }
   0x8   :  { %351 = vmatprep.subr.mxu1 %v153_v10 }
   0x9   :  { %352 = vmatpush3.msra.mxu1 %v137_v11 }
   0xa   :  { %353 = vmatprep.subr.mxu1 %v152_v12 }
   0xb   :  { %12 = vsyncpa [#allocation3], 0  ;;  %354 = vmatpush3.msra.mxu1 %v136_v13  ;;  %v150_v16 = vld [vmem:[%s630_s3 + $0xc8] sm:$0xff]  ;;  %v149_v18 = vld [vmem:[%s630_s3 + $0xc0] sm:$0xff]  ;;  %v31_v39 = vlaneseq  ;;  %vm435_vm2 = vmmov 0   ;;  %vm250_vm3 = vcmask 523264  }
   0xc   :  { %355 = vmatprep.subr.mxu1 %v151_v14  ;;  %v134_v17 = vld [vmem:[%s630_s3 + $0x48] sm:$0xff]  ;;  %v133_v19 = vld [vmem:[%s630_s3 + $0x40] sm:$0xff]  ;;  %v148_v20 = vld [vmem:[%s630_s3 + $0xb8] sm:$0xff]  ;;  %405 = vmatprep.mubr.msk.f32.mxu0 %vm435_vm2, %v434_v3 }
   0xd   :  { %356 = vmatpush3.msra.mxu1 %v135_v15  ;;  %v132_v21 = vld [vmem:[%s630_s3 + $0x38] sm:$0xff]  ;;  %v147_v22 = vld [vmem:[%s630_s3 + $0xb0] sm:$0xff]  ;;  %v146_v24 = vld [vmem:[%s630_s3 + $0xa8] sm:$0xff]  ;;  %v32_v40 = vshrl.u32 %v31_v39, 7 }
   0xe   :  { %357 = vmatprep.subr.mxu1 %v150_v16  ;;  %v131_v23 = vld [vmem:[%s630_s3 + $0x30] sm:$0xff]  ;;  %v130_v25 = vld [vmem:[%s630_s3 + $0x28] sm:$0xff]  ;;  %v145_v26 = vld [vmem:[%s630_s3 + $0xa0] sm:$0xff] }
   0xf   :  { %358 = vmatpush3.msra.mxu1 %v134_v17  ;;  %v129_v27 = vld [vmem:[%s630_s3 + $0x20] sm:$0xff]  ;;  %v144_v28 = vld [vmem:[%s630_s3 + $0x98] sm:$0xff]  ;;  %v143_v30 = vld [vmem:[%s630_s3 + $0x90] sm:$0xff]  ;;  %v33_v41 = vsub.s32 0, %v32_v40  ;;  %v37_v43 = vsub.s32 1, %v32_v40 }
  0x10   :  { %359 = vmatprep.subr.mxu1 %v149_v18  ;;  %v128_v29 = vld [vmem:[%s630_s3 + $0x18] sm:$0xff]  ;;  %v127_v31 = vld [vmem:[%s630_s3 + $0x10] sm:$0xff]  ;;  %v142_v32 = vld [vmem:[%s630_s3 + $0x88] sm:$0xff] }
  0x11   :  { %360 = vmatpush3.msra.mxu1 %v133_v19  ;;  %v126_v33 = vld [vmem:[%s630_s3 + $0x8] sm:$0xff]  ;;  %v141_v34 = vld [vmem:[%s630_s3 + $0x80] sm:$0xff]  ;;  %v242_v36 = vld [vmem:[%s632_s5 + $0x38] sm:$0xff] }
  0x12   :  { %361 = vmatprep.subr.mxu1 %v148_v20  ;;  %v125_v35 = vld [vmem:[%s630_s3] sm:$0xff]  ;;  %v241_v37 = vld [vmem:[%s632_s5 + $0x30] sm:$0xff]  ;;  %390 = vmatpush3.msra.mxu0 %v242_v36  ;;  %v240_v38 = vld [vmem:[%s632_s5 + $0x28] sm:$0xff] }
  0x13   :  { %362 = vmatpush3.msra.mxu1 %v132_v21  ;;  %391 = vmatprep.subr.mxu0 %v434_v3  ;;  %v29_v42 = vld [vmem:[%s629_s2] sm:$0x3]  ;;  %v238_v53 = vld [vmem:[%s632_s5 + $0x18] sm:$0xff]  ;;  %v237_v54 = vld [vmem:[%s632_s5 + $0x10] sm:$0xff] }
  0x14   :  { %363 = vmatprep.subr.mxu1 %v147_v22  ;;  %392 = vmatpush3.msra.mxu0 %v241_v37  ;;  %v34_v44 = vrot.slane %v29_v42, %v33_v41  ;;  %v38_v45 = vrot.slane %v29_v42, %v37_v43  ;;  %v239_v52 = vld [vmem:[%s632_s5 + $0x20] sm:$0xff]  ;;  %v236_v55 = vld [vmem:[%s632_s5 + $0x8] sm:$0xff] }
  0x15   :  { %364 = vmatpush3.msra.mxu1 %v131_v23  ;;  %393 = vmatprep.subr.mxu0 %v434_v3  ;;  %v235_v56 = vld [vmem:[%s632_s5] sm:$0xff]  ;;  %s436_s5 = smov [#allocation2]  }
  0x16   :  { %365 = vmatprep.subr.mxu1 %v146_v24  ;;  %394 = vmatpush3.msra.mxu0 %v240_v38  ;;  %v342_v58 = vld [vmem:[%s631_s4] ss:$0 sm:$0xff]  ;;  %s331_s13 = sshll.u32 %s436_s5, 4  ;;  %s332_s13 = int_to_ptr.vmem [resolvable:$true] %s331_s13 }
  0x17   :  { %366 = vmatpush3.msra.mxu1 %v130_v25  ;;  %395 = vmatprep.subr.mxu0 %v434_v3  ;;  %v343_v63 = vld [vmem:[%s633_s6] ss:$0 sm:$0xff]  ;;  %s412_s14 = scalar_lea.vmem %s332_s13, 128  ;;  %p417_p1 = scmp.lt.s32.totalorder %s332_s13, %s332_s13 }
  0x18   :  { %367 = vmatprep.subr.mxu1 %v145_v26  ;;  %396 = vmatpush3.msra.mxu0 %v239_v52  ;;  %p413_p0 = scmp.ne.s32.totalorder %s332_s13, %s412_s14  ;;  %p418_p2 = scmp.lt.s32.totalorder %s412_s14, %s412_s14 }
  0x19   :  { %368 = vmatpush3.msra.mxu1 %v129_v27  ;;  %397 = vmatprep.subr.mxu0 %v434_v3 }
  0x1a   :  { %369 = vmatprep.subr.mxu1 %v144_v28  ;;  %398 = vmatpush3.msra.mxu0 %v238_v53  ;;  %p419_p3 = por %p418_p2, %p417_p1 }
  0x1b   :  { %370 = vmatpush3.msra.mxu1 %v128_v29  ;;  %399 = vmatprep.subr.mxu0 %v434_v3 }
  0x1c   :  { %371 = vmatprep.subr.mxu1 %v143_v30  ;;  %400 = vmatpush3.msra.mxu0 %v237_v54  ;;  %p420_p4 = pnand %p419_p3, %p413_p0 }
  0x1d   :  { %372 = vmatpush3.msra.mxu1 %v127_v31  ;;  %401 = vmatprep.subr.mxu0 %v434_v3 }
  0x1e   :  { %373 = vmatprep.subr.mxu1 %v142_v32  ;;  %402 = vmatpush3.msra.mxu0 %v236_v55 }
  0x1f   :  { %374 = vmatpush3.msra.mxu1 %v126_v33  ;;  %403 = vmatprep.subr.mxu0 %v434_v3 }
  0x20   :  { %375 = vmatprep.subr.mxu1 %v141_v34  ;;  %404 = vmatpush3.msra.mxu0 %v235_v56 }
  0x21   :  { %376 = vmatpush3.msra.mxu1 %v125_v35 }
  0xc6   :  { %v118_v46 = vpop.f32.mrf.mxu0 }
  0xc7   :  { %v119_v47 = vadd.f32 %v118_v46, %v34_v44 }
  0xc8   :  { %v120_v48 = vpop.f32.mrf.mxu0 }
  0xc9   :  { %v121_v49 = vadd.f32 %v120_v48, %v38_v45  ;;  %v123_v51 = vmax.f32 %v119_v47, 0.0 }
  0xcb   :  { %v124_v50 = vmax.f32 %v121_v49, 0.0 }
  0xcd   :  { %228 = vmatprep.mubr.f32.mxu1 %v124_v50 }
  0xce   :  { %229 = vmatmul.mubr.f32.vlgmr.msra.gmra.mxu1 %v123_v51 }
 0x18e   :  { %v377_v57 = vpop.f32.mrf.mxu1 }
 0x190   :  { %v378_v59 = vpop.f32.mrf.mxu1 }
 0x191   :  { %v379_v60 = vadd.f32 %v378_v59, %v377_v57 }
 0x193   :  { %v231_v61 = vadd.f32 %v379_v60, %v342_v58 }
 0x195   :  { %v234_v62 = vmax.f32 %v231_v61, 0.0 }
 0x197   :  { %406 = vmatmul.mubr.msk.f32.vlgmr.msra.gmra.mxu0 %vm250_vm3, %v234_v62 }
 0x257   :  { %v320_v0 = vpop.f32.mrf.mxu0 }
 0x258   :  { %v321_v1 = vadd.f32 %v343_v63, %v320_v0 }
 0x259   :  { %v407_v2 = vpop.f32.mrf.mxu0 }
 0x25a   :  { %324 = vst [vmem:[#allocation2] sm:$0xff] %v321_v1 }
 0x25b   :  { %423 = shalt.err (!%p420_p4)
}
 0x25c   :  { %334 = dma.vmem_to_hbm [thread:$0]  %s332_s13, 128, %s634_s7, [#allocation3]  }
 0x25d   :  { %432 = dma.done.wait [#allocation3], 128  }
 0x25e   :  { %433 = vsyncadd [#allocation3], 4294967168 }
 0x25f   :  { %338 = vsyncpa [#allocation3], 1 }

</bundles_post_ra>
